<compile_context>
chip_gen: v7x
topology: tpu7x:2x2x1
jax: 0.10.0
libtpu: 0.0.40
codegen_flags: <defaults>
</compile_context>

<pallas_src>
import functools

import jax
import jax.numpy as jnp
from jax.experimental import pallas as pl
from jax.experimental.pallas import tpu as pltpu

_VMEM = pl.BlockSpec(memory_space=pltpu.MemorySpace.VMEM)
_LANE = 128


def _round_up(x, m):
    return ((x + m - 1) // m) * m


def _pick_tile(n, target, align):
    """Largest tile <= target that divides n and is a multiple of `align`,
    falling back to the full dimension (always legal for a BlockSpec)."""
    if n <= target:
        return n
    t = (min(target, n) // align) * align
    while t >= align:
        if n % t == 0:
            return t
        t -= align
    return n


def _vmem_cap_bytes():
    try:
        return int(pltpu.get_tpu_info().vmem_capacity_bytes)
    except Exception:
        return 64 * 1024 * 1024  # conservative: v7x per-TensorCore VMEM


# ------------------------- tiled SAGEConv + ReLU kernel --------------------- #

def _sage_layer_kernel(a_ref, xn_ref, xs_ref, d_ref, wl_ref, wr_ref, b_ref,
                       o_ref, acc_ref, *, tk, x_resident):
    k = pl.program_id(1)

    @pl.when(k == 0)
    def _init():
        acc_ref[...] = jnp.zeros_like(acc_ref)

    # Steady state: stream int8 adjacency tile, upcast (VPU, hidden under the
    # A DMA) and feed the MXU with an f32 accumulator.
    a = a_ref[...].astype(jnp.bfloat16)            # 0/1 int8 -> bf16, exact
    if x_resident:
        start = pl.multiple_of(k * tk, _LANE)
        xn = xn_ref[pl.ds(start, tk), :]           # slice resident x in VMEM
    else:
        xn = xn_ref[...]
    acc_ref[...] += jnp.dot(a, xn, preferred_element_type=jnp.float32)

    @pl.when(k == pl.num_programs(1) - 1)
    def _epilogue():
        # mean aggregation = neighbor-sum scaled by 1/deg (row scale)
        agg = acc_ref[...] * d_ref[...]
        xs = xs_ref[...].astype(jnp.float32)
        h = jnp.dot(agg, wl_ref[...], preferred_element_type=jnp.float32)
        h = h + jnp.dot(xs, wr_ref[...], preferred_element_type=jnp.float32)
        h = h + b_ref[...]
        o_ref[...] = jnp.maximum(h, 0.0).astype(o_ref.dtype)


def sage_layer(adj_i8, x_bf16, inv_deg, w_l, w_r, b, *, tm=None, tk=None):
    n, f_in = x_bf16.shape
    f_out = w_l.shape[1]
    assert adj_i8.shape == (n, n)
    tm = tm if tm is not None else _pick_tile(n, 512, 32)
    tk = tk if tk is not None else _pick_tile(n, 4096, _LANE)
    assert n % tm == 0 and n % tk == 0, (n, tm, tk)
    assert tm % 16 == 0 and tk % _LANE == 0, (tm, tk)
    grid = (n // tm, n // tk)

    cap = _vmem_cap_bytes()
    budget = (3 * cap) // 4                        # never the full v7x 64 MiB

    # VMEM accounting with lane/sublane padding of narrow blocks.
    f_in_p = max(_round_up(f_in, _LANE), _LANE)
    f_out_p = max(_round_up(f_out, _LANE), _LANE)
    fixed = (2 * tm * tk * 1                       # A double buffer (int8)
             + 2 * tm * f_in_p * 2                 # self rows (bf16)
             + 2 * tm * _LANE * 4                  # inv_deg (padded to lane)
             + 2 * tm * f_out_p * 2                # output (bf16)
             + tm * f_in_p * 4                     # f32 accumulator scratch
             + 4 * _round_up(f_in, 8) * f_out_p * 4  # W_l, W_r (dbl buffered)
             + 2 * 8 * f_out_p * 4)                # bias
    resident_xn_bytes = 2 * n * f_in_p * 2         # whole x, dbl-buffer bound
    streamed_xn_bytes = 2 * tk * f_in_p * 2
    x_resident = fixed + resident_xn_bytes <= budget
    vmem_need = fixed + (resident_xn_bytes if x_resident else streamed_xn_bytes)
    vmem_limit = int(min(max(vmem_need + (8 << 20), 32 << 20), budget))

    xn_spec = (pl.BlockSpec((n, f_in), lambda i, k: (0, 0)) if x_resident
               else pl.BlockSpec((tk, f_in), lambda i, k: (k, 0)))

    # Advisory cost estimate: A@x dominates; projections are epilogue work.
    grid_rows = n // tm
    flops = 2 * n * n * f_in + 4 * n * f_in * f_out
    bytes_accessed = (n * n * 1                                   # A (int8)
                      + n * f_in * 2 * ((1 if x_resident else grid_rows) + 1)
                      + n * f_out * 2 + n * 4
                      + (2 * f_in * f_out + f_out) * 4)

    return pl.pallas_call(
        functools.partial(_sage_layer_kernel, tk=tk, x_resident=x_resident),
        out_shape=jax.ShapeDtypeStruct((n, f_out), jnp.bfloat16),
        grid_spec=pltpu.PrefetchScalarGridSpec(
            num_scalar_prefetch=0,
            grid=grid,
            in_specs=[
                pl.BlockSpec((tm, tk), lambda i, k: (i, k)),       # A (int8)
                xn_spec,                                           # x neighbors
                pl.BlockSpec((tm, f_in), lambda i, k: (i, 0)),     # x self rows
                pl.BlockSpec((tm, 1), lambda i, k: (i, 0)),        # 1/deg
                pl.BlockSpec((f_in, f_out), lambda i, k: (0, 0)),  # W_l
                pl.BlockSpec((f_in, f_out), lambda i, k: (0, 0)),  # W_r
                pl.BlockSpec((1, f_out), lambda i, k: (0, 0)),     # bias
            ],
            out_specs=pl.BlockSpec((tm, f_out), lambda i, k: (i, 0)),
            scratch_shapes=[pltpu.VMEM((tm, f_in), jnp.float32)],
        ),
        compiler_params=pltpu.CompilerParams(
            dimension_semantics=("parallel", "arbitrary"),
            vmem_limit_bytes=vmem_limit),
        cost_estimate=pl.CostEstimate(flops=int(flops), transcendentals=0,
                                      bytes_accessed=int(bytes_accessed)),
    )(adj_i8, x_bf16, x_bf16, inv_deg, w_l, w_r, b)


# ------------------------------ MLP head, stage 1 --------------------------- #
# mlp1 (M -> H -> 1) applied row-wise over x2 [B*H, M]; tiled over rows so the
# intermediates stay bounded in VMEM on v7x.

def _mlp1_kernel(x2_ref, w1_ref, b1_ref, w2_ref, b2_ref, v_ref):
    x2 = x2_ref[...].astype(jnp.float32)
    z = jnp.dot(x2, w1_ref[...], preferred_element_type=jnp.float32) + b1_ref[...]
    z = jnp.maximum(z, 0.0)
    v_ref[...] = jnp.dot(z, w2_ref[...], preferred_element_type=jnp.float32) + b2_ref[...]


def mlp1_stage(x2, w1, b1, w2, b2, *, tr=None):
    bh, m = x2.shape
    hd = w1.shape[1]
    tr = tr if tr is not None else _pick_tile(bh, 1024, 16)
    assert bh % tr == 0, (bh, tr)
    return pl.pallas_call(
        _mlp1_kernel,
        out_shape=jax.ShapeDtypeStruct((bh, 1), jnp.float32),
        grid_spec=pltpu.PrefetchScalarGridSpec(
            num_scalar_prefetch=0,
            grid=(bh // tr,),
            in_specs=[
                pl.BlockSpec((tr, m), lambda i: (i, 0)),
                pl.BlockSpec((m, hd), lambda i: (0, 0)),
                pl.BlockSpec((1, hd), lambda i: (0, 0)),
                pl.BlockSpec((hd, 1), lambda i: (0, 0)),
                pl.BlockSpec((1, 1), lambda i: (0, 0)),
            ],
            out_specs=pl.BlockSpec((tr, 1), lambda i: (i, 0)),
        ),
        compiler_params=pltpu.CompilerParams(
            dimension_semantics=("parallel",)),
    )(x2, w1, b1, w2, b2)


# ------------------------------ MLP head, stage 2 --------------------------- #
# BatchNorm(eval) + ReLU + mlp2 (H -> H -> out); [B, H] is tiny -> whole-VMEM.

def _bn_mlp2_kernel(p_ref, g_ref, be_ref, mu_ref, var_ref,
                    w1_ref, b1_ref, w2_ref, b2_ref, o_ref, *, eps):
    p = p_ref[...]
    inv = jax.lax.rsqrt(var_ref[...] + eps)
    q = (p - mu_ref[...]) * inv * g_ref[...] + be_ref[...]
    q = jnp.maximum(q, 0.0)
    r = jnp.dot(q, w1_ref[...], preferred_element_type=jnp.float32) + b1_ref[...]
    r = jnp.maximum(r, 0.0)
    o_ref[...] = jnp.dot(r, w2_ref[...], preferred_element_type=jnp.float32) + b2_ref[...]


def bn_mlp2_stage(p, params, *, eps=1e-5):
    batch = p.shape[0]
    out_dim = params["mlp2_w2"].shape[1]
    return pl.pallas_call(
        functools.partial(_bn_mlp2_kernel, eps=eps),
        out_shape=jax.ShapeDtypeStruct((batch, out_dim), jnp.float32),
        in_specs=[_VMEM] * 9,
        out_specs=_VMEM,
    )(p, params["bn_gamma"], params["bn_beta"], params["bn_mean"], params["bn_var"],
      params["mlp2_w1"], params["mlp2_b1"], params["mlp2_w2"], params["mlp2_b2"])


# ------------------------------- forward pass ------------------------------- #

def graphsage_forward(params, x_feat, gamora_outputs, adj, max_num_nodes,
                      *, tm=None, tk=None):
    # x = torch.cat((data.x, gamora_output[0..2]), 1)
    x = jnp.concatenate([x_feat] + list(gamora_outputs), axis=1).astype(jnp.float32)
    n = x.shape[0]

    # Mean aggregation: only the [N,1] inverse-degree vector is materialized;
    # the row scaling is applied inside the conv-kernel epilogue.
    deg = jnp.sum(adj, axis=1, keepdims=True)
    inv_deg = jnp.where(deg > 0, 1.0 / jnp.maximum(deg, 1.0), 0.0).astype(jnp.float32)

    # Pad node dim to a multiple of 128 so (tm, tk) tiles always divide evenly.
    # Padded rows/cols of A are zero and padded inv_deg is zero -> padded rows
    # never contaminate real rows; they are sliced off before the head.
    n_pad = _round_up(n, _LANE)
    pad = n_pad - n
    adj_i8 = jnp.pad(adj, ((0, pad), (0, pad))).astype(jnp.int8)  # 0/1 exact
    inv_deg = jnp.pad(inv_deg, ((0, pad), (0, 0)))
    x = jnp.pad(x, ((0, pad), (0, 0))).astype(jnp.bfloat16)

    # SAGEConv stack: conv + ReLU fused; dropout treated as identity.
    for (w_l, w_r, b) in params["convs"]:
        x = sage_layer(adj_i8, x, inv_deg, w_l, w_r, b, tm=tm, tk=tk)

    x = x[:n]                                  # drop padded rows
    hdim = x.shape[1]
    m = max_num_nodes
    assert n % m == 0
    batch = n // m

    # x.reshape([-1, hidden_dim, max_num_nodes]) then mlp1 over last dim is
    # equivalent to a row-major flatten to [batch*hidden, max_num_nodes].
    x2 = x.reshape(batch * hdim, m)
    v = mlp1_stage(x2, params["mlp1_w1"], params["mlp1_b1"],
                   params["mlp1_w2"], params["mlp1_b2"])
    p = v.reshape(batch, hdim)                 # cheap wrapper-side reshape
    return bn_mlp2_stage(p, params)


# ----------------------------- pure-JAX reference --------------------------- #

def reference_forward(params, x_feat, gamora_outputs, adj, max_num_nodes):
    x = jnp.concatenate([x_feat] + list(gamora_outputs), axis=1).astype(jnp.float32)
    deg = jnp.sum(adj, axis=1, keepdims=True)
    inv_deg = jnp.where(deg > 0, 1.0 / jnp.maximum(deg, 1.0), 0.0).astype(jnp.float32)
    a = adj.astype(jnp.bfloat16)
    x = x.astype(jnp.bfloat16)
    for (w_l, w_r, b) in params["convs"]:
        agg = jnp.dot(a, x, preferred_element_type=jnp.float32) * inv_deg
        h = agg @ w_l + x.astype(jnp.float32) @ w_r + b
        x = jnp.maximum(h, 0.0).astype(jnp.bfloat16)
    n, hdim = x.shape
    batch = n // max_num_nodes
    x2 = x.reshape(batch * hdim, max_num_nodes).astype(jnp.float32)
    z = jnp.maximum(x2 @ params["mlp1_w1"] + params["mlp1_b1"], 0.0)
    v = z @ params["mlp1_w2"] + params["mlp1_b2"]
    p = v.reshape(batch, hdim)
    q = (p - params["bn_mean"]) * jax.lax.rsqrt(params["bn_var"] + 1e-5)
    q = q * params["bn_gamma"] + params["bn_beta"]
    q = jnp.maximum(q, 0.0)
    r = jnp.maximum(q @ params["mlp2_w1"] + params["mlp2_b1"], 0.0)
    return r @ params["mlp2_w2"] + params["mlp2_b2"]


# ------------------------------ parameter init ------------------------------ #

def init_params(key, in_dim, hidden_dim, out_dim, max_num_nodes, num_layers=4):
    def dense(k, fi, fo, scale=0.1):
        kw, kb = jax.random.split(k)
        w = scale * jax.random.normal(kw, (fi, fo), jnp.float32)
        b = scale * jax.random.normal(kb, (1, fo), jnp.float32)
        return w, b

    keys = jax.random.split(key, num_layers + 8)
    params = {"convs": []}
    dims = [in_dim] + [hidden_dim] * num_layers
    for i in range(num_layers):
        k_l, k_r = jax.random.split(keys[i])
        w_l, b_l = dense(k_l, dims[i], dims[i + 1])
        w_r = 0.1 * jax.random.normal(k_r, (dims[i], dims[i + 1]), jnp.float32)
        params["convs"].append((w_l, w_r, b_l))

    params["mlp1_w1"], params["mlp1_b1"] = dense(keys[num_layers + 0], max_num_nodes, hidden_dim)
    params["mlp1_w2"], params["mlp1_b2"] = dense(keys[num_layers + 1], hidden_dim, 1)
    params["mlp2_w1"], params["mlp2_b1"] = dense(keys[num_layers + 2], hidden_dim, hidden_dim)
    params["mlp2_w2"], params["mlp2_b2"] = dense(keys[num_layers + 3], hidden_dim, out_dim)

    params["bn_gamma"] = jnp.ones((1, hidden_dim), jnp.float32)
    params["bn_beta"] = jnp.zeros((1, hidden_dim), jnp.float32)
    params["bn_mean"] = jnp.zeros((1, hidden_dim), jnp.float32)
    params["bn_var"] = jnp.ones((1, hidden_dim), jnp.float32)
    return params


if __name__ == "__main__":
    key = jax.random.PRNGKey(0)
    k_x, k_g0, k_g1, k_g2, k_adj, k_p = jax.random.split(key, 6)

    # Small shapes consistent with the module's forward:
    #   data.x: [N, 4], three gamora outputs [N, 4] each -> in_dim = 16
    #   hidden_dim = 32, out_dim = 5, max_num_nodes = 16, N = 240 -> batch = 15
    # N = 240 (not a multiple of 128) deliberately exercises the padding path.
    N, F0, HIDDEN, OUT, MAX_NODES = 240, 4, 32, 5, 16

    x_feat = jax.random.normal(k_x, (N, F0), jnp.float32)
    gamora = (jax.random.normal(k_g0, (N, F0), jnp.float32),
              jax.random.normal(k_g1, (N, F0), jnp.float32),
              jax.random.normal(k_g2, (N, F0), jnp.float32))
    adj = jax.random.bernoulli(k_adj, 0.3, (N, N)).astype(jnp.float32)

    params = init_params(k_p, in_dim=4 * F0, hidden_dim=HIDDEN, out_dim=OUT,
                         max_num_nodes=MAX_NODES, num_layers=4)

    # Small tiles here so the demo exercises the (row, reduction) grid, the
    # pl.when init/epilogue paths, and the resident-x dynamic slice;
    # production sizes use the default (512, 4096) targets.
    out = graphsage_forward(params, x_feat, gamora, adj, MAX_NODES, tm=128, tk=128)
    out = jax.block_until_ready(out)
    assert out.shape == (N // MAX_NODES, OUT), out.shape

    ref = jax.block_until_ready(
        reference_forward(params, x_feat, gamora, adj, MAX_NODES))
    assert bool(jnp.allclose(out, ref, rtol=5e-2, atol=5e-2)), (
        float(jnp.max(jnp.abs(out - ref))))
    print("KERNEL_OK")
</pallas_src>

<mosaic_0001>
module attributes {stable_mosaic.version = 11 : i64} {
  func.func @_sage_layer_kernel(%arg0: i32, %arg1: i32, %arg2: memref<128x128xi8, #tpu.memory_space<vmem>>, %arg3: memref<256x16xbf16, #tpu.memory_space<vmem>>, %arg4: memref<128x16xbf16, #tpu.memory_space<vmem>>, %arg5: memref<128x1xf32, #tpu.memory_space<vmem>>, %arg6: memref<16x32xf32, #tpu.memory_space<vmem>>, %arg7: memref<16x32xf32, #tpu.memory_space<vmem>>, %arg8: memref<1x32xf32, #tpu.memory_space<vmem>>, %arg9: memref<128x32xbf16, #tpu.memory_space<vmem>>, %arg10: memref<128x16xf32, #tpu.memory_space<vmem>>) attributes {dimension_semantics = [#tpu.dimension_semantics<parallel>, #tpu.dimension_semantics<arbitrary>], iteration_bounds = array<i64: 2, 2>, scalar_prefetch = 0 : i64, scratch_operands = 1 : i64, tpu.core_type = #tpu.core_type<tc>, window_params = [{transform_indices = @transform_0, window_bounds = array<i64: 128, 128>}, {pipeline_mode = #tpu.pipeline_mode<synchronous>, transform_indices = @transform_1, window_bounds = array<i64: 256, 16>}, {transform_indices = @transform_2, window_bounds = array<i64: 128, 16>}, {transform_indices = @transform_3, window_bounds = array<i64: 128, 1>}, {pipeline_mode = #tpu.pipeline_mode<synchronous>, transform_indices = @transform_4, window_bounds = array<i64: 16, 32>}, {pipeline_mode = #tpu.pipeline_mode<synchronous>, transform_indices = @transform_5, window_bounds = array<i64: 16, 32>}, {pipeline_mode = #tpu.pipeline_mode<synchronous>, transform_indices = @transform_6, window_bounds = array<i64: 1, 32>}, {transform_indices = @transform_7, window_bounds = array<i64: 128, 32>}]} {
    %c0_i32 = arith.constant 0 : i32
    %0 = arith.cmpi eq, %arg1, %c0_i32 : i32
    %1 = arith.extui %0 : i1 to i32
    %c0_i32_0 = arith.constant 0 : i32
    %2 = arith.cmpi ne, %1, %c0_i32_0 : i32
    scf.if %2 {
      %cst_8 = arith.constant 0.000000e+00 : f32
      %16 = vector.broadcast %cst_8 : f32 to vector<128x16xf32>
      %c0_9 = arith.constant 0 : index
      %c0_10 = arith.constant 0 : index
      %17 = vector.load %arg10[%c0_9, %c0_10] : memref<128x16xf32, #tpu.memory_space<vmem>>, vector<128x16xf32>
      tpu.vector_store %arg10[%c0_9, %c0_10], %16 {strides = array<i32>} : memref<128x16xf32, #tpu.memory_space<vmem>>, vector<128x16xf32>,
    } else {
    }
    %c0 = arith.constant 0 : index
    %c0_1 = arith.constant 0 : index
    %3 = vector.load %arg2[%c0, %c0_1] : memref<128x128xi8, #tpu.memory_space<vmem>>, vector<128x128xi8>
    %4 = arith.sitofp %3 : vector<128x128xi8> to vector<128x128xbf16>
    %c128_i32 = arith.constant 128 : i32
    %5 = arith.muli %arg1, %c128_i32 : i32
    %6 = tpu.assume_multiple %5, 128 : i32
    %7 = arith.index_cast %6 : i32 to index
    %c0_2 = arith.constant 0 : index
    %8 = vector.load %arg3[%7, %c0_2] : memref<256x16xbf16, #tpu.memory_space<vmem>>, vector<128x16xbf16>
    %c0_3 = arith.constant 0 : index
    %c0_4 = arith.constant 0 : index
    %9 = vector.load %arg10[%c0_3, %c0_4] : memref<128x16xf32, #tpu.memory_space<vmem>>, vector<128x16xf32>
    %cst = arith.constant dense<0.000000e+00> : vector<128x16xf32>
    %10 = tpu.matmul %4, %8, %cst {dimension_numbers = #tpu.dot_dimension_numbers<[1], [0], [0], [1], [0, 0, 1, 1], [], []>} : vector<128x128xbf16>, vector<128x16xbf16>, vector<128x16xf32> -> vector<128x16xf32>
    %11 = arith.addf %9, %10 : vector<128x16xf32>
    %c0_5 = arith.constant 0 : index
    %c0_6 = arith.constant 0 : index
    %12 = vector.load %arg10[%c0_5, %c0_6] : memref<128x16xf32, #tpu.memory_space<vmem>>, vector<128x16xf32>
    tpu.vector_store %arg10[%c0_5, %c0_6], %11 {strides = array<i32>} : memref<128x16xf32, #tpu.memory_space<vmem>>, vector<128x16xf32>,
    %c1_i32 = arith.constant 1 : i32
    %13 = arith.cmpi eq, %arg1, %c1_i32 : i32
    %14 = arith.extui %13 : i1 to i32
    %c0_i32_7 = arith.constant 0 : i32
    %15 = arith.cmpi ne, %14, %c0_i32_7 : i32
    scf.if %15 {
      %c0_8 = arith.constant 0 : index
      %c0_9 = arith.constant 0 : index
      %16 = vector.load %arg10[%c0_8, %c0_9] : memref<128x16xf32, #tpu.memory_space<vmem>>, vector<128x16xf32>
      %c0_10 = arith.constant 0 : index
      %c0_11 = arith.constant 0 : index
      %17 = vector.load %arg5[%c0_10, %c0_11] : memref<128x1xf32, #tpu.memory_space<vmem>>, vector<128x1xf32>
      %18 = vector.broadcast %17 : vector<128x1xf32> to vector<128x16xf32>
      %19 = arith.mulf %16, %18 : vector<128x16xf32>
      %c0_12 = arith.constant 0 : index
      %c0_13 = arith.constant 0 : index
      %20 = vector.load %arg4[%c0_12, %c0_13] : memref<128x16xbf16, #tpu.memory_space<vmem>>, vector<128x16xbf16>
      %21 = arith.extf %20 : vector<128x16xbf16> to vector<128x16xf32>
      %c0_14 = arith.constant 0 : index
      %c0_15 = arith.constant 0 : index
      %22 = vector.load %arg6[%c0_14, %c0_15] : memref<16x32xf32, #tpu.memory_space<vmem>>, vector<16x32xf32>
      %cst_16 = arith.constant dense<0.000000e+00> : vector<128x32xf32>
      %23 = tpu.matmul %19, %22, %cst_16 {dimension_numbers = #tpu.dot_dimension_numbers<[1], [0], [0], [1], [0, 0, 1, 1], [], []>} : vector<128x16xf32>, vector<16x32xf32>, vector<128x32xf32> -> vector<128x32xf32>
      %c0_17 = arith.constant 0 : index
      %c0_18 = arith.constant 0 : index
      %24 = vector.load %arg7[%c0_17, %c0_18] : memref<16x32xf32, #tpu.memory_space<vmem>>, vector<16x32xf32>
      %cst_19 = arith.constant dense<0.000000e+00> : vector<128x32xf32>
      %25 = tpu.matmul %21, %24, %cst_19 {dimension_numbers = #tpu.dot_dimension_numbers<[1], [0], [0], [1], [0, 0, 1, 1], [], []>} : vector<128x16xf32>, vector<16x32xf32>, vector<128x32xf32> -> vector<128x32xf32>
      %26 = arith.addf %23, %25 : vector<128x32xf32>
      %c0_20 = arith.constant 0 : index
      %c0_21 = arith.constant 0 : index
      %27 = vector.load %arg8[%c0_20, %c0_21] : memref<1x32xf32, #tpu.memory_space<vmem>>, vector<1x32xf32>
      %28 = vector.broadcast %27 : vector<1x32xf32> to vector<128x32xf32>
      %29 = arith.addf %26, %28 : vector<128x32xf32>
      %cst_22 = arith.constant 0.000000e+00 : f32
      %30 = vector.broadcast %cst_22 : f32 to vector<128x32xf32>
      %31 = arith.maximumf %29, %30 : vector<128x32xf32>
      %32 = arith.truncf %31 : vector<128x32xf32> to vector<128x32xbf16>
      %c0_23 = arith.constant 0 : index
      %c0_24 = arith.constant 0 : index
      %33 = vector.load %arg9[%c0_23, %c0_24] : memref<128x32xbf16, #tpu.memory_space<vmem>>, vector<128x32xbf16>
      tpu.vector_store %arg9[%c0_23, %c0_24], %32 {strides = array<i32>} : memref<128x32xbf16, #tpu.memory_space<vmem>>, vector<128x32xbf16>,
    } else {
    }
    return
  }
  func.func @transform_0(%arg0: i32, %arg1: i32) -> (i32, i32) {
    %c0_i32 = arith.constant 0 : i32
    return %arg0, %arg1 : i32, i32
  }
  func.func @transform_1(%arg0: i32, %arg1: i32) -> (i32, i32) {
    %c0_i32 = arith.constant 0 : i32
    %c0_i32_0 = arith.constant 0 : i32
    %c0_i32_1 = arith.constant 0 : i32
    return %c0_i32, %c0_i32_0 : i32, i32
  }
  func.func @transform_2(%arg0: i32, %arg1: i32) -> (i32, i32) {
    %c0_i32 = arith.constant 0 : i32
    %c0_i32_0 = arith.constant 0 : i32
    return %arg0, %c0_i32 : i32, i32
  }
  func.func @transform_3(%arg0: i32, %arg1: i32) -> (i32, i32) {
    %c0_i32 = arith.constant 0 : i32
    %c0_i32_0 = arith.constant 0 : i32
    return %arg0, %c0_i32 : i32, i32
  }
  func.func @transform_4(%arg0: i32, %arg1: i32) -> (i32, i32) {
    %c0_i32 = arith.constant 0 : i32
    %c0_i32_0 = arith.constant 0 : i32
    %c0_i32_1 = arith.constant 0 : i32
    return %c0_i32, %c0_i32_0 : i32, i32
  }
  func.func @transform_5(%arg0: i32, %arg1: i32) -> (i32, i32) {
    %c0_i32 = arith.constant 0 : i32
    %c0_i32_0 = arith.constant 0 : i32
    %c0_i32_1 = arith.constant 0 : i32
    return %c0_i32, %c0_i32_0 : i32, i32
  }
  func.func @transform_6(%arg0: i32, %arg1: i32) -> (i32, i32) {
    %c0_i32 = arith.constant 0 : i32
    %c0_i32_0 = arith.constant 0 : i32
    %c0_i32_1 = arith.constant 0 : i32
    return %c0_i32, %c0_i32_0 : i32, i32
  }
  func.func @transform_7(%arg0: i32, %arg1: i32) -> (i32, i32) {
    %c0_i32 = arith.constant 0 : i32
    %c0_i32_0 = arith.constant 0 : i32
    return %arg0, %c0_i32 : i32, i32
  }
}

</mosaic_0001>

<bundles_post_ra>
// kernel: tpu_custom_call.1
= control target key start
LH: loop header
LB: loop body
LE: loop exit
PB: predicated region body
PF: predicated region fallthrough
CT: control target
= control target key end

     0   :  { %s1894_s24 = smov 0   ;;  %s1896_s25 = smov 0   ;;  %s2187_s0 = inlined_call_operand.vmem [shape: s8[256,256], index: 0, kind: input, shape index: {}]   ;;  %s2188_s1 = inlined_call_operand.vmem [shape: bf16[256,16], index: 1, kind: input, shape index: {}]   ;;  %s2189_s2 = inlined_call_operand.vmem [shape: bf16[256,16], index: 2, kind: input, shape index: {}]   ;;  %s2190_s3 = inlined_call_operand.vmem [shape: f32[256,1], index: 3, kind: input, shape index: {}]   ;;  %s2191_s4 = inlined_call_operand.vmem [shape: f32[16,32], index: 4, kind: input, shape index: {}]   ;;  %s2192_s5 = inlined_call_operand.vmem [shape: f32[16,32], index: 5, kind: input, shape index: {}]   ;;  %s2193_s6 = inlined_call_operand.vmem [shape: f32[1,32], index: 6, kind: input, shape index: {}]   ;;  %s2194_s7 = inlined_call_operand.vmem [shape: bf16[256,32], index: 7, kind: output, shape index: {}]  }
   0x1   :  { %s1898_s26 = smov 0   ;;  %s1900_s27 = smov 0  }
   0x2   :  { %s1902_s28 = smov 0   ;;  %s1904_s29 = smov 0  }
   0x3   :  { %s1906_s30 = smov 0  }
   0x4 LB: > { %s26_s8 = sadd.s32 1, %s1842_s28  ;;  %s29_s9 = sadd.s32 1, %s1846_s29  ;;  %s1850_s30 = sphi %s1906_s30, %s17_s30   ;;  %s1846_s29 = sphi %s1904_s29, %s2200_s29   ;;  %s1842_s28 = sphi %s1902_s28, %s2199_s28   ;;  %s1838_s27 = sphi %s1900_s27, %s2198_s27   ;;  %s1834_s26 = sphi %s1898_s26, %s2197_s26   ;;  %s1830_s25 = sphi %s1896_s25, %s2196_s25   ;;  %s1826_s24 = sphi %s1894_s24, %s2195_s24  }
   0x5   : > { %p27_p0 = scmp.ge.s32.totalorder %s26_s8, 2  ;;  %p45_p1 = scmp.ne.s32.totalorder %s1830_s25, %s1826_s24 }
   0x6   : > { %p46_p2 = scmp.eq.s32.totalorder %s1850_s30, 0  ;;  %s38_s13 = sadd.s32 1, %s1830_s25 }
   0x7   : > { %s2202_s8 = smov (%p27_p0, %s26_s8), 0  ;;  %s2204_s9 = smov (!%p27_p0, %s29_s9), %s1846_s29 }
   0x8   : > { %p47_p3 = por %p46_p2, %p45_p1  ;;  %p31_p4 = scmp.ge.s32.totalorder %s2204_s9, 2 }
   0x9   : > { %s34_s10 = ssub.s32 %s1842_s28, %s2202_s8  ;;  %p1416_p6 = scmp.ge.s32.totalorder %s1850_s30, 4 }
   0xa   : > { %s2206_s9 = smov (%p31_p4, %s2204_s9), 0 }
   0xb   : > { %s33_s11 = ssub.s32 %s1846_s29, %s2206_s9  ;;  %245 = sbr.rel (%p1416_p6) target bundleno = 26 (0x1a), region = 32 }
   0xc   : > { %s35_s12 = sor.u32 %s34_s10, %s33_s11 }
   0xd   : > { %p36_p5 = scmp.eq.s32.totalorder %s35_s12, 0 }
   0xf   : > { %s1945_s14 = scalar_select %p36_p5, %s1830_s25, %s38_s13  }
  0x12   : > { %248 = sbr.rel (!%p47_p3) target bundleno = 26 (0x1a), region = 36  ;;  %s250_s15 = sand.u32 (%p47_p3), 1, %s1830_s25  }
  0x13   : > { %s1492_s16 = sshll.u32 (%p47_p3), %s1846_s29, 3  ;;  %s1417_s17 = sshll.u32 (%p47_p3), %s250_s15, 5 }
  0x14   : > { %s255_s18 = sadd.s32 (%p47_p3), %s1842_s28, %s1492_s16  ;;  %s252_s23 = scalar_lea.vmem (%p47_p3), [#allocation3], %s1417_s17 }
  0x15   : > { %s1420_s19 = sshll.u32 (%p47_p3), %s255_s18, 3 }
  0x16   : > { %s257_s22 = scalar_lea.vmem (%p47_p3), %s2187_s0, %s1420_s19 }
  0x17   : > { %v291_v0 = vld [vmem:[%s257_s22] sm:$0xff] (%p47_p3)  ;;  %v293_v1 = vld [vmem:[%s257_s22 + $0x10] sm:$0xff] (%p47_p3) }
  0x18   : > { %v295_v2 = vld [vmem:[%s257_s22 + $0x20] sm:$0xff] (%p47_p3)  ;;  %292 = vst [vmem:[%s252_s23] sm:$0xff] (%p47_p3), %v291_v0  ;;  %294 = vst [vmem:[%s252_s23 + $0x8] sm:$0xff] (%p47_p3), %v293_v1  ;;  %v297_v3 = vld [vmem:[%s257_s22 + $0x30] sm:$0xff] (%p47_p3) }
  0x19   : > { %296 = vst [vmem:[%s252_s23 + $0x10] sm:$0xff] %v295_v2  ;;  %298 = vst [vmem:[%s252_s23 + $0x18] sm:$0xff] %v297_v3 }
  0x1a PF: > { %p1421_p7 = scmp.ge.s32.totalorder %s1850_s30, 1  ;;  %p321_p8 = scmp.lt.s32.totalorder %s1850_s30, 5 }
  0x1c   : > { %p322_p9 = pnand %p1421_p7, %p321_p8 }
  0x1d   : > { %s328_s10 = sand.u32 (!%p322_p9), 1, %s1826_s24   ;;  %s1423_s11 = sshll.u32 (!%p322_p9), %s1838_s27, 4 }
  0x1e   : > { %325 = sbr.rel (%p322_p9) target bundleno = 666 (0x29a), region = 82  ;;  %s1422_s12 = sshll.u32 (!%p322_p9), %s328_s10, 5 }
  0x1f   : > { %p371_p10 = scmp.lt.s32.totalorder (!%p322_p9), %s1423_s11, 31  ;;  %s1973_s27 = scalar_lea.vmem (!%p322_p9), [#allocation3], %s1422_s12 }
  0x20   : > { %p1429_p11 = scmp.ne.s32.totalorder (!%p322_p9), %s1834_s26, 0 }
  0x25   : > { %s2208_s11 = smov (!%p371_p10, %s1423_s11), 31  ;;  %392 = sbr.rel (%p1429_p11) target bundleno = 47 (0x2f), region = 90 }
  0x26   : > { %s1424_s13 = sshll.u32 %s2208_s11, 2  ;;  %s1426_s15 = sshll.u32 %s2208_s11, 3  ;;  %vm393_vm0 = vcmask (!%p1429_p11), 130048   ;;  %v1852_v4 = vmov (!%p1429_p11), 0.0  }
  0x27   : > { %s1961_s18 = scalar_lea.vmem %s2189_s2, %s1424_s13  ;;  %s1966_s21 = scalar_lea.vmem %s2190_s3, %s1426_s15  ;;  %394 = vst.msk [vmem:[#allocation2] sm:$0xff] (!%p1429_p11), %vm393_vm0, %v1852_v4  ;;  %395 = vst.msk [vmem:[#allocation2 + $0x8] sm:$0xff] (!%p1429_p11), %vm393_vm0, %v1852_v4 }
  0x28   : > { %s1971_s24 = scalar_lea.vmem %s2194_s7, %s1424_s13  ;;  %396 = vst.msk [vmem:[#allocation2 + $0x10] sm:$0xff] (!%p1429_p11), %vm393_vm0, %v1852_v4  ;;  %397 = vst.msk [vmem:[#allocation2 + $0x18] sm:$0xff] (!%p1429_p11), %vm393_vm0, %v1852_v4 }
  0x29   : > { %398 = vst.msk [vmem:[#allocation2 + $0x20] sm:$0xff] (!%p1429_p11), %vm393_vm0, %v1852_v4  ;;  %399 = vst.msk [vmem:[#allocation2 + $0x28] sm:$0xff] (!%p1429_p11), %vm393_vm0, %v1852_v4 }
  0x2a   : > { %400 = vst.msk [vmem:[#allocation2 + $0x30] sm:$0xff] (!%p1429_p11), %vm393_vm0, %v1852_v4  ;;  %401 = vst.msk [vmem:[#allocation2 + $0x38] sm:$0xff] (!%p1429_p11), %vm393_vm0, %v1852_v4 }
  0x2b   : > { %402 = vst.msk [vmem:[#allocation2 + $0x40] sm:$0xff] (!%p1429_p11), %vm393_vm0, %v1852_v4  ;;  %403 = vst.msk [vmem:[#allocation2 + $0x48] sm:$0xff] (!%p1429_p11), %vm393_vm0, %v1852_v4 }
  0x2c   : > { %404 = vst.msk [vmem:[#allocation2 + $0x50] sm:$0xff] %vm393_vm0, %v1852_v4  ;;  %405 = vst.msk [vmem:[#allocation2 + $0x58] sm:$0xff] %vm393_vm0, %v1852_v4 }
  0x2d   : > { %406 = vst.msk [vmem:[#allocation2 + $0x60] sm:$0xff] %vm393_vm0, %v1852_v4  ;;  %407 = vst.msk [vmem:[#allocation2 + $0x68] sm:$0xff] %vm393_vm0, %v1852_v4 }
  0x2e   : > { %408 = vst.msk [vmem:[#allocation2 + $0x70] sm:$0xff] %vm393_vm0, %v1852_v4  ;;  %409 = vst.msk [vmem:[#allocation2 + $0x78] sm:$0xff] %vm393_vm0, %v1852_v4 }
  0x2f PF: > { %s1430_s10 = sshll.u32 %s1834_s26, 7  ;;  %v410_v5 = vld [vmem:[%s1973_s27] sm:$0xff]  ;;  %v412_v6 = vld [vmem:[%s1973_s27 + $0x10] sm:$0xff]  ;;  %v411_v17 = vld [vmem:[%s1973_s27 + $0x8] sm:$0xff]  ;;  %vm620_vm1 = vcmask 130048   ;;  %p1440_p12 = scmp.ne.s32.totalorder %s1834_s26, 1 }
  0x30   : > { %s423_s11 = sshra.s32 %s1430_s10, 3  ;;  %v414_v7 = vunpack.c.l.s8.bf16 %v410_v5  ;;  %v418_v8 = vunpack.c.l.s8.bf16 %v412_v6  ;;  %v413_v18 = vld [vmem:[%s1973_s27 + $0x18] sm:$0xff]  ;;  %v415_v19 = vunpack.c.h.s8.bf16 %v410_v5  ;;  %v419_v20 = vunpack.c.h.s8.bf16 %v412_v6 }
  0x31   : > { %s1431_s12 = sshll.u32 %s423_s11, 2  ;;  %v416_v21 = vunpack.c.l.s8.bf16 %v411_v17  ;;  %v420_v22 = vunpack.c.l.s8.bf16 %v413_v18  ;;  %v417_v23 = vunpack.c.h.s8.bf16 %v411_v17  ;;  %v421_v24 = vunpack.c.h.s8.bf16 %v413_v18  ;;  %v443_v27 = vld [vmem:[#allocation2] sm:$0xff]  ;;  %v444_v37 = vld [vmem:[#allocation2 + $0x8] sm:$0xff] }
  0x32   : > { %s1998_s16 = scalar_lea.vmem %s2188_s1, %s1431_s12  ;;  %1616 = vmatprep.mubr.bf16.mxu0 %v414_v7  ;;  %1624 = vmatprep.mubr.bf16.mxu1 %v418_v8  ;;  %v445_v25 = vld [vmem:[#allocation2 + $0x10] sm:$0xff]  ;;  %v446_v31 = vld [vmem:[#allocation2 + $0x18] sm:$0xff]  ;;  %v802_v17 = vld [vmem:[%s2191_s4 + $0x8] sm:$0xff] (!%p1440_p12)  ;;  %vm1294_vm2 = vcmask (!%p1440_p12), 257024  }
  0x33   : > { %v1786_v9 = vld [vmem:[%s1998_s16] sm:$0xff]   ;;  %v1787_v10 = vld [vmem:[%s1998_s16 + $0x8] sm:$0xff]   ;;  %v1788_v11 = vld [vmem:[%s1998_s16 + $0x10] sm:$0xff]  }
  0x34   : > { %1600 = vmatprep.subr.bf16.mxu0 %v1786_v9  ;;  %1696 = vmatprep.subr.bf16.mxu1 %v1786_v9  ;;  %v1789_v12 = vld [vmem:[%s1998_s16 + $0x18] sm:$0xff]   ;;  %v1790_v13 = vld [vmem:[%s1998_s16 + $0x20] sm:$0xff]   ;;  %v1791_v14 = vld [vmem:[%s1998_s16 + $0x28] sm:$0xff]  }
  0x35   : > { %1601 = vmatpush3.bf16.msra.mxu0 %v1786_v9  ;;  %1704 = vmatpush3.bf16.msra.mxu1 %v1786_v9  ;;  %v1792_v15 = vld [vmem:[%s1998_s16 + $0x30] sm:$0xff]   ;;  %v1793_v16 = vld [vmem:[%s1998_s16 + $0x38] sm:$0xff]   ;;  %v451_v28 = vld [vmem:[#allocation2 + $0x40] sm:$0xff] }
  0x36   : > { %1602 = vmatprep.subr.bf16.mxu0 %v1787_v10  ;;  %1697 = vmatprep.subr.bf16.mxu1 %v1787_v10  ;;  %v453_v26 = vld [vmem:[#allocation2 + $0x50] sm:$0xff]  ;;  %v454_v32 = vld [vmem:[#allocation2 + $0x58] sm:$0xff]  ;;  %v452_v38 = vld [vmem:[#allocation2 + $0x48] sm:$0xff] }
  0x37   : > { %v449_v49 = vld [vmem:[#allocation2 + $0x30] sm:$0xff]  ;;  %v447_v51 = vld [vmem:[#allocation2 + $0x20] sm:$0xff]  ;;  %v450_v55 = vld [vmem:[#allocation2 + $0x38] sm:$0xff] }
  0x38   : > { %v457_v50 = vld [vmem:[#allocation2 + $0x70] sm:$0xff]  ;;  %v455_v52 = vld [vmem:[#allocation2 + $0x60] sm:$0xff]  ;;  %v458_v56 = vld [vmem:[#allocation2 + $0x78] sm:$0xff] }
  0x39   : > { %1603 = vmatpush3.bf16.msra.mxu0 %v1787_v10  ;;  %1705 = vmatpush3.bf16.msra.mxu1 %v1787_v10  ;;  %v448_v61 = vld [vmem:[#allocation2 + $0x28] sm:$0xff]  ;;  %v659_v9 = vld [vmem:[%s1966_s21 + $0x10] sm:$0xff] (!%p1440_p12)  ;;  %v657_v10 = vld [vmem:[%s1966_s21] sm:$0xff] (!%p1440_p12) }
  0x3a   : > { %1604 = vmatprep.subr.bf16.mxu0 %v1788_v11  ;;  %1698 = vmatprep.subr.bf16.mxu1 %v1788_v11  ;;  %v456_v62 = vld [vmem:[#allocation2 + $0x68] sm:$0xff] }
  0x3b   : > { %v662_v18 = vld [vmem:[%s1966_s21 + $0x28] sm:$0xff] (!%p1440_p12) }
  0x3d   : > { %1605 = vmatpush3.bf16.msra.mxu0 %v1788_v11  ;;  %1706 = vmatpush3.bf16.msra.mxu1 %v1788_v11  ;;  %v1853_v11 = vmov (!%p1440_p12), 0  }
  0x3e   : > { %1606 = vmatprep.subr.bf16.mxu0 %v1789_v12  ;;  %1699 = vmatprep.subr.bf16.mxu1 %v1789_v12 }
  0x3f   : > { %1795 = vset.pattern.permute.xlu1 (!%p1440_p12), %v1853_v11  ;;  %1794 = vset.pattern.permute.xlu0 (!%p1440_p12), %v1853_v11 }
  0x40   : > { %685 = vperm.xlu1 (!%p1440_p12), %1795, %v659_v9   ;;  %675 = vperm.xlu0 (!%p1440_p12), %1794, %v657_v10  }
  0x41   : > { %1607 = vmatpush3.bf16.msra.mxu0 %v1789_v12  ;;  %1707 = vmatpush3.bf16.msra.mxu1 %v1789_v12  ;;  %v660_v12 = vld [vmem:[%s1966_s21 + $0x18] sm:$0xff] (!%p1440_p12) }
  0x42   : > { %1608 = vmatprep.subr.bf16.mxu0 %v1790_v13  ;;  %1700 = vmatprep.subr.bf16.mxu1 %v1790_v13 }
  0x44   : > { %690 = vperm.xlu1 (!%p1440_p12), %1795, %v660_v12  }
  0x45   : > { %1609 = vmatpush3.bf16.msra.mxu0 %v1790_v13  ;;  %1708 = vmatpush3.bf16.msra.mxu1 %v1790_v13  ;;  %v658_v13 = vld [vmem:[%s1966_s21 + $0x8] sm:$0xff] (!%p1440_p12) }
  0x46   : > { %1610 = vmatprep.subr.bf16.mxu0 %v1791_v14  ;;  %1701 = vmatprep.subr.bf16.mxu1 %v1791_v14 }
  0x47   : > { %680 = vperm.xlu0 (!%p1440_p12), %1794, %v658_v13  }
  0x48   : > { %700 = vperm.xlu1 (!%p1440_p12), %1795, %v662_v18  }
  0x49   : > { %1611 = vmatpush3.bf16.msra.mxu0 %v1791_v14  ;;  %1709 = vmatpush3.bf16.msra.mxu1 %v1791_v14  ;;  %v803_v14 = vld [vmem:[%s2192_s5] sm:$0xff] (!%p1440_p12) }
  0x4a   : > { %1612 = vmatprep.subr.bf16.mxu0 %v1792_v15  ;;  %1702 = vmatprep.subr.bf16.mxu1 %v1792_v15 }
  0x4d   : > { %1613 = vmatpush3.bf16.msra.mxu0 %v1792_v15  ;;  %1710 = vmatpush3.bf16.msra.mxu1 %v1792_v15  ;;  %v804_v15 = vld [vmem:[%s2192_s5 + $0x8] sm:$0xff] (!%p1440_p12) }
  0x4e   : > { %1614 = vmatprep.subr.bf16.mxu0 %v1793_v16  ;;  %1703 = vmatprep.subr.bf16.mxu1 %v1793_v16 }
  0x51   : > { %1615 = vmatpush3.bf16.msra.mxu0 %v1793_v16  ;;  %1711 = vmatpush3.bf16.msra.mxu1 %v1793_v16  ;;  %v801_v16 = vld [vmem:[%s2191_s4] sm:$0xff] (!%p1440_p12) }
  0x54   : > { %1617 = vmatmul.mubr.bf16.vlgmr.msra.gmra.mrb[0].mxu0 %v415_v19  ;;  %1625 = vmatmul.mubr.bf16.vlgmr.msra.gmra.mrb[0].mxu1 %v419_v20  ;;  %v661_v19 = vld [vmem:[%s1966_s21 + $0x20] sm:$0xff] (!%p1440_p12)  ;;  %v1688_v20 = vpack.c.bf16 (!%p1440_p12), %v804_v15, %v803_v14 }
  0x55   : > { %1620 = vmatprep.mubr.bf16.mxu0 %v416_v21  ;;  %1628 = vmatprep.mubr.bf16.mxu1 %v420_v22  ;;  %v1692_v21 = vpack.c.bf16 (!%p1440_p12), %v802_v17, %v801_v16  ;;  %v1510_v22 = vld [vmem:[%s1961_s18] sm:$0xff] (!%p1440_p12)  }
  0x56   : > { %1689 = vmatprep.subr.bf16.mxu1 (!%p1440_p12), %v1688_v20  ;;  %695 = vperm.xlu0 (!%p1440_p12), %1794, %v661_v19  }
  0x57   : > { %1693 = vmatprep.subr.bf16.mxu0 (!%p1440_p12), %v1692_v21  ;;  %1691 = vmatpush3.bf16.msra.mxu1 (!%p1440_p12), %v1688_v20 }
  0x58   : > { %1695 = vmatpush3.bf16.msra.mxu0 (!%p1440_p12), %v1692_v21 }
  0x5c   : > { %1621 = vmatmul.mubr.bf16.gmra.mrb[4].mxu0 %v417_v23  ;;  %1629 = vmatmul.mubr.bf16.gmra.mrb[4].mxu1 %v421_v24  ;;  %v1511_v23 = vunpack.c.l.bf16 (!%p1440_p12), %v1510_v22  ;;  %v1541_v24 = vld [vmem:[%s1961_s18 + $0x8] sm:$0xff] (!%p1440_p12)  }
  0x5e   : > { %1636 = vmatprep.mubr.msk.f32.mxu1 (!%p1440_p12), %vm620_vm1, %v1511_v23 }
 0x127   : > { %v1618_v29 = vpop.f32.mrb[0].mxu0  ;;  %v1626_v30 = vpop.f32.mrb[0].mxu1 }
 0x128   : > { %v606_v33 = vadd.f32 %v1618_v29, %v445_v25  ;;  %v614_v34 = vadd.f32 %v1626_v30, %v453_v26  ;;  %v541_v35 = vpop.f32.mrb[1].mxu0  ;;  %v573_v36 = vpop.f32.mrb[1].mxu1  ;;  %v664_v25 = vld [vmem:[%s1966_s21 + $0x38] sm:$0xff] (!%p1440_p12)  ;;  %v663_v26 = vld [vmem:[%s1966_s21 + $0x30] sm:$0xff] (!%p1440_p12)  ;;  %v666_v30 = vld [vmem:[%s1966_s21 + $0x48] sm:$0xff] (!%p1440_p12) }
 0x129   : > { %v604_v39 = vadd.f32 %v541_v35, %v443_v27  ;;  %v612_v40 = vadd.f32 %v573_v36, %v451_v28  ;;  %v1619_v41 = vpop.f32.mrb[2].mxu0  ;;  %v1627_v42 = vpop.f32.mrb[2].mxu1  ;;  %v1512_v27 = vunpack.c.h.bf16 (!%p1440_p12), %v1510_v22  ;;  %v1515_v28 = vunpack.c.l.bf16 (!%p1440_p12), %v1541_v24  ;;  %v1542_v29 = vld [vmem:[%s1961_s18 + $0x10] sm:$0xff] (!%p1440_p12)   ;;  %710 = vperm.xlu1 (!%p1440_p12), %1795, %v664_v25   ;;  %705 = vperm.xlu0 (!%p1440_p12), %1794, %v663_v26   ;;  %v668_v35 = vld [vmem:[%s1966_s21 + $0x58] sm:$0xff] (!%p1440_p12) }
 0x12a   : > { %623 = vst.msk [vmem:[#allocation2 + $0x10] sm:$0xff] %vm620_vm1, %v606_v33  ;;  %631 = vst.msk [vmem:[#allocation2 + $0x50] sm:$0xff] %vm620_vm1, %v614_v34  ;;  %v607_v43 = vadd.f32 %v1619_v41, %v446_v31  ;;  %v615_v44 = vadd.f32 %v1627_v42, %v454_v32  ;;  %v544_v45 = vpop.f32.mrb[3].mxu0  ;;  %v576_v46 = vpop.f32.mrb[3].mxu1  ;;  %v665_v31 = vld [vmem:[%s1966_s21 + $0x40] sm:$0xff] (!%p1440_p12)  ;;  %v1516_v32 = vunpack.c.h.bf16 (!%p1440_p12), %v1541_v24  ;;  %v1519_v33 = vunpack.c.l.bf16 (!%p1440_p12), %v1542_v29  ;;  %v1543_v34 = vld [vmem:[%s1961_s18 + $0x18] sm:$0xff] (!%p1440_p12)  }
 0x12b   : > { %621 = vst.msk [vmem:[#allocation2] sm:$0xff] %vm620_vm1, %v604_v39  ;;  %629 = vst.msk [vmem:[#allocation2 + $0x40] sm:$0xff] %vm620_vm1, %v612_v40  ;;  %v605_v47 = vadd.f32 %v544_v45, %v444_v37  ;;  %v613_v48 = vadd.f32 %v576_v46, %v452_v38  ;;  %1637 = vmatmul.mubr.msk.f32.vlgmr.msra.gmra.mrb[0].mxu1 (!%p1440_p12), %vm620_vm1, %v1512_v27  ;;  %v667_v36 = vld [vmem:[%s1966_s21 + $0x50] sm:$0xff] (!%p1440_p12)  ;;  %v1520_v37 = vunpack.c.h.bf16 (!%p1440_p12), %v1542_v29  ;;  %v1523_v38 = vunpack.c.l.bf16 (!%p1440_p12), %v1543_v34  ;;  %v1544_v39 = vld [vmem:[%s1961_s18 + $0x20] sm:$0xff] (!%p1440_p12)  }
 0x12c   : > { %624 = vst.msk [vmem:[#allocation2 + $0x18] sm:$0xff] %vm620_vm1, %v607_v43  ;;  %632 = vst.msk [vmem:[#allocation2 + $0x58] sm:$0xff] %vm620_vm1, %v615_v44  ;;  %1639 = vmatprep.mubr.msk.f32.mxu1 (!%p1440_p12), %vm620_vm1, %v1515_v28  ;;  %v670_v40 = vld [vmem:[%s1966_s21 + $0x68] sm:$0xff] (!%p1440_p12)  ;;  %v669_v41 = vld [vmem:[%s1966_s21 + $0x60] sm:$0xff] (!%p1440_p12)  ;;  %v1524_v42 = vunpack.c.h.bf16 (!%p1440_p12), %v1543_v34  ;;  %v1527_v43 = vunpack.c.l.bf16 (!%p1440_p12), %v1544_v39 }
 0x12d   : > { %622 = vst.msk [vmem:[#allocation2 + $0x8] sm:$0xff] %vm620_vm1, %v605_v47  ;;  %630 = vst.msk [vmem:[#allocation2 + $0x48] sm:$0xff] %vm620_vm1, %v613_v48  ;;  %720 = vperm.xlu1 (!%p1440_p12), %1795, %v666_v30   ;;  %715 = vperm.xlu0 (!%p1440_p12), %1794, %v665_v31   ;;  %v1545_v44 = vld [vmem:[%s1961_s18 + $0x28] sm:$0xff] (!%p1440_p12)   ;;  %v672_v45 = vld [vmem:[%s1966_s21 + $0x78] sm:$0xff] (!%p1440_p12)  ;;  %v1528_v47 = vunpack.c.h.bf16 (!%p1440_p12), %v1544_v39 }
 0x12e   : > { %v671_v46 = vld [vmem:[%s1966_s21 + $0x70] sm:$0xff] (!%p1440_p12)  ;;  %v1531_v48 = vunpack.c.l.bf16 (!%p1440_p12), %v1545_v44 }
 0x12f   : > { %v1622_v53 = vpop.f32.mrb[4].mxu0  ;;  %v1630_v54 = vpop.f32.mrb[4].mxu1  ;;  %640 = sbr.rel (%p1440_p12) target bundleno = 666 (0x29a), region = 94  ;;  %1640 = vmatmul.mubr.msk.f32.gmra.mrb[2].mxu1 (!%p1440_p12), %vm620_vm1, %v1516_v32 }
 0x130   : > { %v610_v57 = vadd.f32 %v1622_v53, %v449_v49  ;;  %v618_v58 = vadd.f32 %v1630_v54, %v457_v50  ;;  %v557_v59 = vpop.f32.mrb[5].mxu0  ;;  %v589_v60 = vpop.f32.mrb[5].mxu1  ;;  %1642 = vmatprep.mubr.msk.f32.mxu1 (!%p1440_p12), %vm620_vm1, %v1519_v33  ;;  %v1546_v49 = vld [vmem:[%s1961_s18 + $0x30] sm:$0xff] (!%p1440_p12)   ;;  %v1532_v50 = vunpack.c.h.bf16 (!%p1440_p12), %v1545_v44 }
 0x131   : > { %v608_v63 = vadd.f32 %v557_v59, %v447_v51  ;;  %v616_v0 = vadd.f32 %v589_v60, %v455_v52  ;;  %v1623_v1 = vpop.f32.mrb[6].mxu0  ;;  %v1631_v2 = vpop.f32.mrb[6].mxu1  ;;  %730 = vperm.xlu1 (!%p1440_p12), %1795, %v668_v35   ;;  %725 = vperm.xlu0 (!%p1440_p12), %1794, %v667_v36   ;;  %v1535_v51 = vunpack.c.l.bf16 (!%p1440_p12), %v1546_v49  ;;  %v1547_v52 = vld [vmem:[%s1961_s18 + $0x38] sm:$0xff] (!%p1440_p12)   ;;  %v1536_v53 = vunpack.c.h.bf16 (!%p1440_p12), %v1546_v49  ;;  %v643_v59 = vld [vmem:[#allocation2 + $0x10] sm:$0xff] (!%p1440_p12) }
 0x132   : > { %627 = vst.msk [vmem:[#allocation2 + $0x30] sm:$0xff] %vm620_vm1, %v610_v57  ;;  %635 = vst.msk [vmem:[#allocation2 + $0x70] sm:$0xff] %vm620_vm1, %v618_v58  ;;  %v611_v3 = vadd.f32 %v1623_v1, %v450_v55  ;;  %v619_v4 = vadd.f32 %v1631_v2, %v458_v56  ;;  %v560_v5 = vpop.f32.mrb[7].mxu0  ;;  %v592_v6 = vpop.f32.mrb[7].mxu1  ;;  %v1539_v54 = vunpack.c.l.bf16 (!%p1440_p12), %v1547_v52  ;;  %v1540_v55 = vunpack.c.h.bf16 (!%p1440_p12), %v1547_v52  ;;  %v641_v56 = vld [vmem:[#allocation2] sm:$0xff] (!%p1440_p12)  ;;  %v651_v21 = vld [vmem:[#allocation2 + $0x50] sm:$0xff] (!%p1440_p12) }
 0x133   : > { %625 = vst.msk [vmem:[#allocation2 + $0x20] sm:$0xff] %vm620_vm1, %v608_v63  ;;  %633 = vst.msk [vmem:[#allocation2 + $0x60] sm:$0xff] %vm620_vm1, %v616_v0  ;;  %v609_v7 = vadd.f32 %v560_v5, %v448_v61  ;;  %v617_v8 = vadd.f32 %v592_v6, %v456_v62  ;;  %1643 = vmatmul.mubr.msk.f32.gmra.mrb[4].mxu1 (!%p1440_p12), %vm620_vm1, %v1520_v37  ;;  %v686_v57 = vpop.permute.xlu1 (!%p1440_p12), %685  ;;  %v676_v58 = vpop.permute.xlu0 (!%p1440_p12), %675  ;;  %v644_v2 = vld [vmem:[#allocation2 + $0x18] sm:$0xff] (!%p1440_p12)  ;;  %v649_v15 = vld [vmem:[#allocation2 + $0x40] sm:$0xff] (!%p1440_p12) }
 0x134   : > { %628 = vst.msk [vmem:[#allocation2 + $0x38] sm:$0xff] %vm620_vm1, %v611_v3  ;;  %636 = vst.msk [vmem:[#allocation2 + $0x78] sm:$0xff] %vm620_vm1, %v619_v4  ;;  %1645 = vmatprep.mubr.msk.f32.mxu1 (!%p1440_p12), %vm620_vm1, %v1523_v38  ;;  %v753_v60 = vmul.f32 (!%p1440_p12), %v676_v58, %v641_v56  ;;  %v642_v61 = vld [vmem:[#allocation2 + $0x8] sm:$0xff] (!%p1440_p12)  ;;  %v755_v62 = vmul.f32 (!%p1440_p12), %v686_v57, %v643_v59  ;;  %v652_v26 = vld [vmem:[#allocation2 + $0x58] sm:$0xff] (!%p1440_p12) }
 0x135   : > { %626 = vst.msk [vmem:[#allocation2 + $0x28] sm:$0xff] %vm620_vm1, %v609_v7  ;;  %634 = vst.msk [vmem:[#allocation2 + $0x68] sm:$0xff] %vm620_vm1, %v617_v8  ;;  %740 = vperm.xlu1 (!%p1440_p12), %1795, %v670_v40   ;;  %735 = vperm.xlu0 (!%p1440_p12), %1794, %v669_v41   ;;  %v650_v20 = vld [vmem:[#allocation2 + $0x48] sm:$0xff] (!%p1440_p12)  ;;  %v2110_v57 = vld [vmem:[%s2193_s6] ss:$0 sm:$0xff] (!%p1440_p12) }
 0x136   : > { %1664 = vmatprep.mubr.msk.f32.mxu0 %vm620_vm1, %v753_v60 }
 0x137   : > { %1646 = vmatmul.mubr.msk.f32.gmra.mrb[6].mxu1 %vm620_vm1, %v1524_v42  ;;  %v691_v63 = vpop.permute.xlu1 %690  ;;  %v681_v0 = vpop.permute.xlu0 %680 }
 0x138   : > { %1648 = vmatprep.mubr.msk.f32.mxu1 %vm620_vm1, %v1527_v43  ;;  %v754_v1 = vmul.f32 %v681_v0, %v642_v61  ;;  %v756_v6 = vmul.f32 %v691_v63, %v644_v2 }
 0x139   : > { %750 = vperm.xlu1 %1795, %v672_v45   ;;  %745 = vperm.xlu0 %1794, %v671_v46   ;;  %v647_v9 = vld [vmem:[#allocation2 + $0x30] sm:$0xff] }
 0x13a   : > { %v645_v3 = vld [vmem:[#allocation2 + $0x20] sm:$0xff]  ;;  %1665 = vmatmul.mubr.msk.f32.vlgmr.msra.gmra.mrb[0].mxu0 %vm620_vm1, %v754_v1  ;;  %v655_v33 = vld [vmem:[#allocation2 + $0x70] sm:$0xff] }
 0x13b   : > { %1649 = vmatmul.mubr.msk.f32.gmra.mrb[8].mxu1 %vm620_vm1, %v1528_v47  ;;  %v701_v4 = vpop.permute.xlu1 %700  ;;  %v696_v5 = vpop.permute.xlu0 %695  ;;  %1667 = vmatprep.mubr.msk.f32.mxu0 %vm620_vm1, %v755_v62  ;;  %v648_v14 = vld [vmem:[#allocation2 + $0x38] sm:$0xff]  ;;  %v653_v27 = vld [vmem:[#allocation2 + $0x60] sm:$0xff] }
 0x13c   : > { %1651 = vmatprep.mubr.msk.f32.mxu1 %vm620_vm1, %v1531_v48  ;;  %v757_v7 = vmul.f32 %v696_v5, %v645_v3  ;;  %v646_v8 = vld [vmem:[#allocation2 + $0x28] sm:$0xff]  ;;  %v656_v38 = vld [vmem:[#allocation2 + $0x78] sm:$0xff] }
 0x13d   : > { %v758_v12 = vmul.f32 %v701_v4, %v646_v8  ;;  %v654_v32 = vld [vmem:[#allocation2 + $0x68] sm:$0xff] }
 0x13e   : > { %1668 = vmatmul.mubr.msk.f32.gmra.mrb[2].mxu0 %vm620_vm1, %v756_v6 }
 0x13f   : > { %1652 = vmatmul.mubr.msk.f32.gmra.mrb[10].mxu1 %vm620_vm1, %v1532_v50  ;;  %1670 = vmatprep.mubr.msk.f32.mxu0 %vm620_vm1, %v757_v7 }
 0x140   : > { %1654 = vmatprep.mubr.msk.f32.mxu1 %vm620_vm1, %v1535_v51 }
 0x142   : > { %1671 = vmatmul.mubr.msk.f32.gmra.mrb[4].mxu0 %vm620_vm1, %v758_v12 }
 0x143   : > { %1655 = vmatmul.mubr.msk.f32.gmra.mrb[12].mxu1 %vm620_vm1, %v1536_v53 }
 0x144   : > { %1657 = vmatprep.mubr.msk.f32.mxu1 %vm620_vm1, %v1539_v54 }
 0x147   : > { %1658 = vmatmul.mubr.msk.f32.gmra.mrb[14].mxu1 %vm620_vm1, %v1540_v55 }
 0x1a8   : > { %v711_v10 = vpop.permute.xlu1 %710  ;;  %v706_v11 = vpop.permute.xlu0 %705 }
 0x1a9   : > { %v759_v13 = vmul.f32 %v706_v11, %v647_v9  ;;  %v760_v18 = vmul.f32 %v711_v10, %v648_v14 }
 0x1ab   : > { %1673 = vmatprep.mubr.msk.f32.mxu0 %vm620_vm1, %v759_v13 }
 0x1ac   : > { %v721_v16 = vpop.permute.xlu1 %720  ;;  %v716_v17 = vpop.permute.xlu0 %715  ;;  %1674 = vmatmul.mubr.msk.f32.gmra.mrb[6].mxu0 %vm620_vm1, %v760_v18 }
 0x1ad   : > { %v761_v19 = vmul.f32 %v716_v17, %v649_v15  ;;  %v762_v24 = vmul.f32 %v721_v16, %v650_v20 }
 0x1af   : > { %1676 = vmatprep.mubr.msk.f32.mxu0 %vm620_vm1, %v761_v19 }
 0x1b0   : > { %v731_v22 = vpop.permute.xlu1 %730  ;;  %v726_v23 = vpop.permute.xlu0 %725  ;;  %1677 = vmatmul.mubr.msk.f32.gmra.mrb[8].mxu0 %vm620_vm1, %v762_v24 }
 0x1b1   : > { %v763_v25 = vmul.f32 %v726_v23, %v651_v21  ;;  %v764_v30 = vmul.f32 %v731_v22, %v652_v26 }
 0x1b3   : > { %1679 = vmatprep.mubr.msk.f32.mxu0 %vm620_vm1, %v763_v25 }
 0x1b4   : > { %v741_v28 = vpop.permute.xlu1 %740  ;;  %v736_v29 = vpop.permute.xlu0 %735  ;;  %1680 = vmatmul.mubr.msk.f32.gmra.mrb[10].mxu0 %vm620_vm1, %v764_v30 }
 0x1b5   : > { %v765_v31 = vmul.f32 %v736_v29, %v653_v27  ;;  %v766_v35 = vmul.f32 %v741_v28, %v654_v32 }
 0x1b7   : > { %1682 = vmatprep.mubr.msk.f32.mxu0 %vm620_vm1, %v765_v31 }
 0x1b8   : > { %v746_v34 = vpop.permute.xlu0 %745  ;;  %v751_v37 = vpop.permute.xlu1 %750  ;;  %1683 = vmatmul.mubr.msk.f32.gmra.mrb[12].mxu0 %vm620_vm1, %v766_v35 }
 0x1b9   : > { %v767_v36 = vmul.f32 %v746_v34, %v655_v33  ;;  %v768_v39 = vmul.f32 %v751_v37, %v656_v38 }
 0x1bb   : > { %1685 = vmatprep.mubr.msk.f32.mxu0 %vm620_vm1, %v767_v36 }
 0x1bc   : > { %1686 = vmatmul.mubr.msk.f32.gmra.mrb[14].mxu0 %vm620_vm1, %v768_v39 }
 0x1fe   : > { %v1638_v40 = vpop.f32.mrb[0].mxu1 }
 0x1ff   : > { %v919_v41 = vpop.f32.mrb[1].mxu1 }
 0x202   : > { %v1641_v42 = vpop.f32.mrb[2].mxu1 }
 0x203   : > { %v929_v43 = vpop.f32.mrb[3].mxu1 }
 0x206   : > { %v1644_v44 = vpop.f32.mrb[4].mxu1 }
 0x207   : > { %v939_v45 = vpop.f32.mrb[5].mxu1 }
 0x20a   : > { %v1647_v46 = vpop.f32.mrb[6].mxu1 }
 0x20b   : > { %v949_v47 = vpop.f32.mrb[7].mxu1 }
 0x20d   : > { %v1666_v56 = vpop.f32.mrb[0].mxu0 }
 0x20e   : > { %v1650_v48 = vpop.f32.mrb[8].mxu1  ;;  %v1118_v58 = vadd.f32 %v1666_v56, %v1638_v40  ;;  %v1112_v59 = vpop.f32.mrb[1].mxu0 }
 0x20f   : > { %v959_v49 = vpop.f32.mrb[9].mxu1  ;;  %v1113_v60 = vadd.f32 %v1112_v59, %v919_v41 }
 0x210   : > { %v1199_v61 = vadd.f32 %v2110_v57, %v1118_v58 }
 0x211   : > { %v1198_v62 = vadd.f32 %v2110_v57, %v1113_v60  ;;  %v1669_v63 = vpop.f32.mrb[2].mxu0 }
 0x212   : > { %v2095_v50 = vpop.f32.mrb[10].mxu1  ;;  %v1215_v0 = vmax.f32 %v1199_v61, 0.0  ;;  %v1128_v1 = vadd.f32 %v1669_v63, %v1641_v42  ;;  %v1122_v2 = vpop.f32.mrb[3].mxu0 }
 0x213   : > { %v2097_v51 = vpop.f32.mrb[11].mxu1  ;;  %v1214_v3 = vmax.f32 %v1198_v62, 0.0  ;;  %v1123_v4 = vadd.f32 %v1122_v2, %v929_v43 }
 0x214   : > { %v1494_v5 = vpack.c.bf16 %v1215_v0, %v1215_v0  ;;  %v1201_v6 = vadd.f32 %v2110_v57, %v1128_v1 }
 0x215   : > { %v1493_v7 = vpack.c.bf16 %v1214_v3, %v1214_v3  ;;  %v1200_v8 = vadd.f32 %v2110_v57, %v1123_v4  ;;  %v1672_v9 = vpop.f32.mrb[4].mxu0 }
 0x216   : > { %v2099_v52 = vpop.f32.mrb[12].mxu1  ;;  %1296 = vst.msk [vmem:[%s1971_s24 + $0x4] sm:$0xf] %vm1294_vm2, %v1494_v5  ;;  %v1217_v10 = vmax.f32 %v1201_v6, 0.0  ;;  %v1138_v11 = vadd.f32 %v1672_v9, %v1644_v44  ;;  %v1132_v12 = vpop.f32.mrb[5].mxu0 }
 0x217   : > { %v2101_v53 = vpop.f32.mrb[13].mxu1  ;;  %1295 = vst.msk [vmem:[%s1971_s24] sm:$0xf] %vm1294_vm2, %v1493_v7  ;;  %v1216_v13 = vmax.f32 %v1200_v8, 0.0  ;;  %v1133_v14 = vadd.f32 %v1132_v12, %v939_v45 }
 0x218   : > { %v1496_v15 = vpack.c.bf16 %v1217_v10, %v1217_v10  ;;  %v1203_v16 = vadd.f32 %v2110_v57, %v1138_v11 }
 0x219   : > { %v1495_v17 = vpack.c.bf16 %v1216_v13, %v1216_v13  ;;  %v1202_v18 = vadd.f32 %v2110_v57, %v1133_v14 }
 0x21a   : > { %v2103_v54 = vpop.f32.mrb[14].mxu1  ;;  %1298 = vst.msk [vmem:[%s1971_s24 + $0xc] sm:$0xf] %vm1294_vm2, %v1496_v15  ;;  %v1219_v20 = vmax.f32 %v1203_v16, 0.0 }
 0x21b   : > { %v2105_v55 = vpop.f32.mrb[15].mxu1  ;;  %1297 = vst.msk [vmem:[%s1971_s24 + $0x8] sm:$0xf] %vm1294_vm2, %v1495_v17  ;;  %v1218_v23 = vmax.f32 %v1202_v18, 0.0 }
 0x21c   : > { %v1498_v25 = vpack.c.bf16 %v1219_v20, %v1219_v20 }
 0x21d   : > { %v1497_v27 = vpack.c.bf16 %v1218_v23, %v1218_v23 }
 0x21e   : > { %1300 = vst.msk [vmem:[%s1971_s24 + $0x14] sm:$0xf] %vm1294_vm2, %v1498_v25 }
 0x21f   : > { %1299 = vst.msk [vmem:[%s1971_s24 + $0x10] sm:$0xf] %vm1294_vm2, %v1497_v27 }
 0x27f   : > { %v1675_v19 = vpop.f32.mrb[6].mxu0 }
 0x280   : > { %v1148_v21 = vadd.f32 %v1675_v19, %v1647_v46  ;;  %v1142_v22 = vpop.f32.mrb[7].mxu0 }
 0x281   : > { %v1143_v24 = vadd.f32 %v1142_v22, %v949_v47 }
 0x282   : > { %v1205_v26 = vadd.f32 %v2110_v57, %v1148_v21 }
 0x283   : > { %v1204_v28 = vadd.f32 %v2110_v57, %v1143_v24  ;;  %v1678_v29 = vpop.f32.mrb[8].mxu0 }
 0x284   : > { %v1221_v30 = vmax.f32 %v1205_v26, 0.0  ;;  %v1158_v31 = vadd.f32 %v1678_v29, %v1650_v48  ;;  %v1152_v32 = vpop.f32.mrb[9].mxu0 }
 0x285   : > { %v1220_v33 = vmax.f32 %v1204_v28, 0.0  ;;  %v1153_v34 = vadd.f32 %v1152_v32, %v959_v49 }
 0x286   : > { %v1500_v35 = vpack.c.bf16 %v1221_v30, %v1221_v30  ;;  %v1207_v36 = vadd.f32 %v2110_v57, %v1158_v31 }
 0x287   : > { %v1499_v37 = vpack.c.bf16 %v1220_v33, %v1220_v33  ;;  %v1206_v38 = vadd.f32 %v2110_v57, %v1153_v34  ;;  %v1681_v39 = vpop.f32.mrb[10].mxu0 }
 0x288   : > { %1302 = vst.msk [vmem:[%s1971_s24 + $0x1c] sm:$0xf] %vm1294_vm2, %v1500_v35  ;;  %v1223_v40 = vmax.f32 %v1207_v36, 0.0  ;;  %v1168_v41 = vadd.f32 %v1681_v39, %v2095_v50  ;;  %v1162_v42 = vpop.f32.mrb[11].mxu0 }
 0x289   : > { %1301 = vst.msk [vmem:[%s1971_s24 + $0x18] sm:$0xf] %vm1294_vm2, %v1499_v37  ;;  %v1222_v43 = vmax.f32 %v1206_v38, 0.0  ;;  %v1163_v44 = vadd.f32 %v1162_v42, %v2097_v51 }
 0x28a   : > { %v1502_v45 = vpack.c.bf16 %v1223_v40, %v1223_v40  ;;  %v1209_v46 = vadd.f32 %v2110_v57, %v1168_v41 }
 0x28b   : > { %v1501_v47 = vpack.c.bf16 %v1222_v43, %v1222_v43  ;;  %v1208_v48 = vadd.f32 %v2110_v57, %v1163_v44  ;;  %v1684_v49 = vpop.f32.mrb[12].mxu0 }
 0x28c   : > { %1304 = vst.msk [vmem:[%s1971_s24 + $0x24] sm:$0xf] %vm1294_vm2, %v1502_v45  ;;  %v1225_v56 = vmax.f32 %v1209_v46, 0.0  ;;  %v1178_v50 = vadd.f32 %v1684_v49, %v2099_v52  ;;  %v1172_v58 = vpop.f32.mrb[13].mxu0 }
 0x28d   : > { %1303 = vst.msk [vmem:[%s1971_s24 + $0x20] sm:$0xf] %vm1294_vm2, %v1501_v47  ;;  %v1224_v59 = vmax.f32 %v1208_v48, 0.0  ;;  %v1173_v51 = vadd.f32 %v1172_v58, %v2101_v53 }
 0x28e   : > { %v1504_v60 = vpack.c.bf16 %v1225_v56, %v1225_v56  ;;  %v1211_v61 = vadd.f32 %v2110_v57, %v1178_v50 }
 0x28f   : > { %v1503_v62 = vpack.c.bf16 %v1224_v59, %v1224_v59  ;;  %v1210_v63 = vadd.f32 %v2110_v57, %v1173_v51  ;;  %v1687_v0 = vpop.f32.mrb[14].mxu0 }
 0x290   : > { %1306 = vst.msk [vmem:[%s1971_s24 + $0x2c] sm:$0xf] %vm1294_vm2, %v1504_v60  ;;  %v1227_v1 = vmax.f32 %v1211_v61, 0.0  ;;  %v1188_v52 = vadd.f32 %v1687_v0, %v2103_v54  ;;  %v1182_v2 = vpop.f32.mrb[15].mxu0 }
 0x291   : > { %1305 = vst.msk [vmem:[%s1971_s24 + $0x28] sm:$0xf] %vm1294_vm2, %v1503_v62  ;;  %v1226_v53 = vmax.f32 %v1210_v63, 0.0  ;;  %v1183_v3 = vadd.f32 %v1182_v2, %v2105_v55 }
 0x292   : > { %v1506_v4 = vpack.c.bf16 %v1227_v1, %v1227_v1  ;;  %v1213_v5 = vadd.f32 %v2110_v57, %v1188_v52 }
 0x293   : > { %v1505_v6 = vpack.c.bf16 %v1226_v53, %v1226_v53  ;;  %v1212_v7 = vadd.f32 %v2110_v57, %v1183_v3 }
 0x294   : > { %1308 = vst.msk [vmem:[%s1971_s24 + $0x34] sm:$0xf] %vm1294_vm2, %v1506_v4  ;;  %v1229_v8 = vmax.f32 %v1213_v5, 0.0 }
 0x295   : > { %1307 = vst.msk [vmem:[%s1971_s24 + $0x30] sm:$0xf] %vm1294_vm2, %v1505_v6  ;;  %v1228_v9 = vmax.f32 %v1212_v7, 0.0 }
 0x296   : > { %v1508_v54 = vpack.c.bf16 %v1229_v8, %v1229_v8 }
 0x297   : > { %v1507_v10 = vpack.c.bf16 %v1228_v9, %v1228_v9 }
 0x298   : > { %1310 = vst.msk [vmem:[%s1971_s24 + $0x3c] sm:$0xf] %vm1294_vm2, %v1508_v54 }
 0x299   : > { %1309 = vst.msk [vmem:[%s1971_s24 + $0x38] sm:$0xf] %vm1294_vm2, %v1507_v10 }
 0x29a PF: > { %s17_s30 = sadd.s32 1, %s1850_s30   ;;  %s2195_s24 = smov %s1830_s25 }
 0x29b   : > { %p14_p13 = scmp.ge.s32.totalorder %s17_s30, 6   ;;  %s2196_s25 = smov %s1945_s14 }
 0x29c   : > { %s2197_s26 = smov %s1842_s28  ;;  %s2198_s27 = smov %s1846_s29 }
 0x29d   : > { %s2199_s28 = smov %s2202_s8  ;;  %s2200_s29 = smov %s2206_s9 }
 0x29e   :  { %16 = sbr.rel (!%p14_p13) target bundleno = 4 (0x4), region = 136 }

</bundles_post_ra>
